<compile_context>
chip_gen: v7x
topology: tpu7x:2x2x1
jax: 0.10.0
libtpu: 0.0.40
codegen_flags: <defaults>
</compile_context>

<pallas_src>
import jax
import jax.numpy as jnp
from jax.experimental import pallas as pl
from jax.experimental.pallas import tpu as pltpu


# ----------------------------------------------------------------------------
# Generic SAGE layer:  out = ReLU( [mean_agg(x) | x] @ [W_l ; W_r] + b )
# ----------------------------------------------------------------------------
def sage_layer_kernel(a_ref, xk_ref, xi_ref, w_ref, b_ref, out_ref, cat_ref):
    # Grid: (row tiles i, reduction tiles k); k is the innermost axis.
    k = pl.program_id(1)
    c = xi_ref.shape[1]  # static input-channel count

    @pl.when(k == 0)
    def _():
        cat_ref[...] = jnp.zeros_like(cat_ref)

    # Partial mean-aggregation for this row tile, accumulated (f32) into the
    # left half of the fused-activation scratch:  cat[:, :C] += A[i,k] @ x[k].
    cat_ref[:, :c] += jnp.dot(
        a_ref[...], xk_ref[...], preferred_element_type=jnp.float32)

    @pl.when(k == pl.num_programs(1) - 1)
    def _():
        # Right half: the self (lin_r) term's input rows for this row tile.
        cat_ref[:, c:] = xi_ref[...].astype(jnp.float32)
        # Single fused MXU pass:  [agg | x] @ [W_l ; W_r]  + b, then ReLU.
        h = jnp.dot(cat_ref[...].astype(w_ref.dtype), w_ref[...],
                    preferred_element_type=jnp.float32)
        h = h + b_ref[...]
        out_ref[...] = jnp.maximum(h, 0.0).astype(out_ref.dtype)


def sage_layer(a_bf16, x_bf16, w_cat, b, *, tm=128, tk=128,
               out_dtype=jnp.bfloat16):
    n = a_bf16.shape[0]
    c = x_bf16.shape[1]
    h_out = w_cat.shape[1]
    assert n % tm == 0 and n % tk == 0, "demo assumes N divisible by tile sizes"

    grid = (n // tm, n // tk)
    return pl.pallas_call(
        sage_layer_kernel,
        out_shape=jax.ShapeDtypeStruct((n, h_out), out_dtype),
        grid_spec=pltpu.PrefetchScalarGridSpec(
            num_scalar_prefetch=0,
            grid=grid,
            in_specs=[
                # A tile, streamed / double-buffered along k (bf16).
                pl.BlockSpec((tm, tk), lambda i, k: (i, k)),
                # Feature rows for the aggregation RHS (depends on k).
                pl.BlockSpec((tk, c), lambda i, k: (k, 0)),
                # Feature rows for the self (lin_r) term (depends on i only ->
                # fetched once per row tile).
                pl.BlockSpec((tm, c), lambda i, k: (i, 0)),
                # Fused weight [W_l ; W_r] and bias: fully resident (tiny).
                pl.BlockSpec((2 * c, h_out), lambda i, k: (0, 0)),
                pl.BlockSpec((1, h_out), lambda i, k: (0, 0)),
            ],
            out_specs=pl.BlockSpec((tm, h_out), lambda i, k: (i, 0)),
            # Fused-activation / aggregation accumulator [agg | x] in f32.
            scratch_shapes=[pltpu.VMEM((tm, 2 * c), jnp.float32)],
        ),
        compiler_params=pltpu.CompilerParams(
            # Row tiles are independent (megacore-parallel on v7x); the
            # K-reduction must stay sequential.
            dimension_semantics=("parallel", "arbitrary"),
            # Safe on all generations at these tile sizes; raise to 48-64 MiB
            # (v5e/v6e) when using 512-2048-wide A tiles at N=20000.
            vmem_limit_bytes=32 * 1024 * 1024,
        ),
    )(a_bf16, x_bf16, x_bf16, w_cat, b)


# ----------------------------------------------------------------------------
# fc2: Linear(N, 1) on the squeezed per-node scalars, as a VPU multiply+reduce.
# ----------------------------------------------------------------------------
def fc_reduce_kernel(w_ref, h_ref, out_ref):
    prod = w_ref[...] * h_ref[...]                      # VPU elementwise
    col = jnp.sum(prod, axis=1, keepdims=True)          # lane reduce (XLU)
    out_ref[...] = jnp.sum(col, axis=0, keepdims=True)  # sublane reduce


def fc_linear(wfc, h2, bfc):
    n = h2.shape[0]
    assert n % 128 == 0, "demo assumes N divisible by 128"
    # Lane-dense operands: reshape both to (N//128, 128) f32 (wrapper-side
    # layout plumbing only; row-major flattening keeps elements paired).
    w2d = wfc.astype(jnp.float32).reshape(n // 128, 128)
    h2d = h2.astype(jnp.float32).reshape(n // 128, 128)
    vmem = pl.BlockSpec(memory_space=pltpu.MemorySpace.VMEM)
    dot = pl.pallas_call(
        fc_reduce_kernel,
        out_shape=jax.ShapeDtypeStruct((1, 1), jnp.float32),
        in_specs=[vmem, vmem],
        out_specs=vmem,
    )(w2d, h2d)
    # fc2 bias folded here (one scalar add) instead of a padded VMEM operand.
    return (dot + bfc).reshape(1)


# ----------------------------------------------------------------------------
# Full forward pass
# ----------------------------------------------------------------------------
def gcn_forward(a, x, params, *, tm=128, tk=128):
    (w1l, w1r, b1, w2l, w2r, b2, wfc, bfc) = params

    # bf16 for the HBM-bound operands; f32 biases (added post-accumulation).
    a_bf = a.astype(jnp.bfloat16)
    x_bf = x.astype(jnp.bfloat16)
    w1cat = jnp.concatenate([w1l, w1r], axis=0).astype(jnp.bfloat16)  # [2*C, H]
    w2cat = jnp.concatenate([w2l, w2r], axis=0).astype(jnp.bfloat16)  # [2*H, 1]

    h1 = sage_layer(a_bf, x_bf, w1cat, b1, tm=tm, tk=tk,
                    out_dtype=jnp.bfloat16)   # SAGEConv1 + ReLU (+ dropout=id)
    h2 = sage_layer(a_bf, h1, w2cat, b2, tm=tm, tk=tk,
                    out_dtype=jnp.float32)    # SAGEConv2 + ReLU (+ dropout=id)
    # squeeze(x, 1) then fc2: Linear(N, 1)
    return fc_linear(wfc, h2, bfc)


def build_mean_adj(edge_index, num_nodes):
    """Dense mean-aggregation matrix from a [2, E] edge_index (src row 0, dst row 1)."""
    src, dst = edge_index[0], edge_index[1]
    adj = jnp.zeros((num_nodes, num_nodes), jnp.float32).at[dst, src].add(1.0)
    deg = adj.sum(axis=1, keepdims=True)
    return adj / jnp.maximum(deg, 1.0)


if __name__ == "__main__":
    # Small stand-in for the 20000-node graph; N=256 gives a non-trivial
    # (2, 2) grid with 128x128 A tiles.
    N, C_IN, HID, E = 256, 4, 32, 1024

    key = jax.random.PRNGKey(0)
    ks = jax.random.split(key, 10)

    x = jax.random.normal(ks[0], (N, C_IN), jnp.float32)
    edge_index = jax.random.randint(ks[1], (2, E), 0, N)
    a = build_mean_adj(edge_index, N)

    # Parameter shapes from GCNModel.__init__:
    #   conv1 = SAGEConv(C_IN, HID), conv2 = SAGEConv(HID, 1), fc2 = Linear(N, 1)
    w1l = jax.random.normal(ks[2], (C_IN, HID), jnp.float32) * 0.1  # lin_l W^T
    w1r = jax.random.normal(ks[3], (C_IN, HID), jnp.float32) * 0.1  # lin_r W^T
    b1 = jax.random.normal(ks[4], (1, HID), jnp.float32) * 0.1
    w2l = jax.random.normal(ks[5], (HID, 1), jnp.float32) * 0.1
    w2r = jax.random.normal(ks[6], (HID, 1), jnp.float32) * 0.1
    b2 = jax.random.normal(ks[7], (1, 1), jnp.float32) * 0.1
    wfc = jax.random.normal(ks[8], (1, N), jnp.float32) * 0.1        # fc2 weight
    bfc = jax.random.normal(ks[9], (1, 1), jnp.float32) * 0.1        # fc2 bias

    params = (w1l, w1r, b1, w2l, w2r, b2, wfc, bfc)
    pred = jax.block_until_ready(gcn_forward(a, x, params))

    # Pure-JAX reference mirroring the kernel's dtypes (bf16 operands, f32 acc).
    a_bf = a.astype(jnp.bfloat16)
    x_bf = x.astype(jnp.bfloat16)
    w1cat = jnp.concatenate([w1l, w1r], axis=0).astype(jnp.bfloat16)
    w2cat = jnp.concatenate([w2l, w2r], axis=0).astype(jnp.bfloat16)

    agg1 = jnp.dot(a_bf, x_bf, preferred_element_type=jnp.float32)
    cat1 = jnp.concatenate([agg1.astype(jnp.bfloat16), x_bf], axis=-1)
    h1_ref = jnp.maximum(
        jnp.dot(cat1, w1cat, preferred_element_type=jnp.float32) + b1,
        0.0).astype(jnp.bfloat16)
    agg2 = jnp.dot(a_bf, h1_ref, preferred_element_type=jnp.float32)
    cat2 = jnp.concatenate([agg2.astype(jnp.bfloat16), h1_ref], axis=-1)
    h2_ref = jnp.maximum(
        jnp.dot(cat2, w2cat, preferred_element_type=jnp.float32) + b2, 0.0)
    ref = (jnp.dot(wfc, h2_ref) + bfc).reshape(1)

    assert pred.shape == (1,), pred.shape
    assert jnp.allclose(pred, ref, rtol=2e-2, atol=2e-2), (pred, ref)
    print("KERNEL_OK")
</pallas_src>

<mosaic_0001>
module attributes {stable_mosaic.version = 11 : i64} {
  func.func @sage_layer_kernel(%arg0: i32, %arg1: i32, %arg2: memref<128x128xbf16, #tpu.memory_space<vmem>>, %arg3: memref<128x4xbf16, #tpu.memory_space<vmem>>, %arg4: memref<128x4xbf16, #tpu.memory_space<vmem>>, %arg5: memref<8x32xbf16, #tpu.memory_space<vmem>>, %arg6: memref<1x32xf32, #tpu.memory_space<vmem>>, %arg7: memref<128x32xbf16, #tpu.memory_space<vmem>>, %arg8: memref<128x8xf32, #tpu.memory_space<vmem>>) attributes {dimension_semantics = [#tpu.dimension_semantics<parallel>, #tpu.dimension_semantics<arbitrary>], iteration_bounds = array<i64: 2, 2>, scalar_prefetch = 0 : i64, scratch_operands = 1 : i64, tpu.core_type = #tpu.core_type<tc>, window_params = [{transform_indices = @transform_0, window_bounds = array<i64: 128, 128>}, {transform_indices = @transform_1, window_bounds = array<i64: 128, 4>}, {transform_indices = @transform_2, window_bounds = array<i64: 128, 4>}, {pipeline_mode = #tpu.pipeline_mode<synchronous>, transform_indices = @transform_3, window_bounds = array<i64: 8, 32>}, {pipeline_mode = #tpu.pipeline_mode<synchronous>, transform_indices = @transform_4, window_bounds = array<i64: 1, 32>}, {transform_indices = @transform_5, window_bounds = array<i64: 128, 32>}]} {
    %c0_i32 = arith.constant 0 : i32
    %0 = arith.cmpi eq, %arg1, %c0_i32 : i32
    %1 = arith.extui %0 : i1 to i32
    %c0_i32_0 = arith.constant 0 : i32
    %2 = arith.cmpi ne, %1, %c0_i32_0 : i32
    scf.if %2 {
      %cst_9 = arith.constant 0.000000e+00 : f32
      %12 = vector.broadcast %cst_9 : f32 to vector<128x8xf32>
      %c0_10 = arith.constant 0 : index
      %c0_11 = arith.constant 0 : index
      %13 = vector.load %arg8[%c0_10, %c0_11] : memref<128x8xf32, #tpu.memory_space<vmem>>, vector<128x8xf32>
      tpu.vector_store %arg8[%c0_10, %c0_11], %12 {strides = array<i32>} : memref<128x8xf32, #tpu.memory_space<vmem>>, vector<128x8xf32>,
    } else {
    }
    %c0 = arith.constant 0 : index
    %c0_1 = arith.constant 0 : index
    %3 = vector.load %arg8[%c0, %c0_1] : memref<128x8xf32, #tpu.memory_space<vmem>>, vector<128x4xf32>
    %c0_2 = arith.constant 0 : index
    %c0_3 = arith.constant 0 : index
    %4 = vector.load %arg2[%c0_2, %c0_3] : memref<128x128xbf16, #tpu.memory_space<vmem>>, vector<128x128xbf16>
    %c0_4 = arith.constant 0 : index
    %c0_5 = arith.constant 0 : index
    %5 = vector.load %arg3[%c0_4, %c0_5] : memref<128x4xbf16, #tpu.memory_space<vmem>>, vector<128x4xbf16>
    %cst = arith.constant dense<0.000000e+00> : vector<128x4xf32>
    %6 = tpu.matmul %4, %5, %cst {dimension_numbers = #tpu.dot_dimension_numbers<[1], [0], [0], [1], [0, 0, 1, 1], [], []>} : vector<128x128xbf16>, vector<128x4xbf16>, vector<128x4xf32> -> vector<128x4xf32>
    %7 = arith.addf %3, %6 : vector<128x4xf32>
    %c0_6 = arith.constant 0 : index
    %c0_7 = arith.constant 0 : index
    %8 = vector.load %arg8[%c0_6, %c0_7] : memref<128x8xf32, #tpu.memory_space<vmem>>, vector<128x4xf32>
    tpu.vector_store %arg8[%c0_6, %c0_7], %7 {strides = array<i32>} : memref<128x8xf32, #tpu.memory_space<vmem>>, vector<128x4xf32>,
    %c1_i32 = arith.constant 1 : i32
    %9 = arith.cmpi eq, %arg1, %c1_i32 : i32
    %10 = arith.extui %9 : i1 to i32
    %c0_i32_8 = arith.constant 0 : i32
    %11 = arith.cmpi ne, %10, %c0_i32_8 : i32
    scf.if %11 {
      %c0_9 = arith.constant 0 : index
      %c0_10 = arith.constant 0 : index
      %12 = vector.load %arg4[%c0_9, %c0_10] : memref<128x4xbf16, #tpu.memory_space<vmem>>, vector<128x4xbf16>
      %13 = arith.extf %12 : vector<128x4xbf16> to vector<128x4xf32>
      %c0_11 = arith.constant 0 : index
      %c4 = arith.constant 4 : index
      %14 = vector.load %arg8[%c0_11, %c4] : memref<128x8xf32, #tpu.memory_space<vmem>>, vector<128x4xf32>
      tpu.vector_store %arg8[%c0_11, %c4], %13 {strides = array<i32>} : memref<128x8xf32, #tpu.memory_space<vmem>>, vector<128x4xf32>,
      %c0_12 = arith.constant 0 : index
      %c0_13 = arith.constant 0 : index
      %15 = vector.load %arg8[%c0_12, %c0_13] : memref<128x8xf32, #tpu.memory_space<vmem>>, vector<128x8xf32>
      %16 = arith.truncf %15 : vector<128x8xf32> to vector<128x8xbf16>
      %c0_14 = arith.constant 0 : index
      %c0_15 = arith.constant 0 : index
      %17 = vector.load %arg5[%c0_14, %c0_15] : memref<8x32xbf16, #tpu.memory_space<vmem>>, vector<8x32xbf16>
      %cst_16 = arith.constant dense<0.000000e+00> : vector<128x32xf32>
      %18 = tpu.matmul %16, %17, %cst_16 {dimension_numbers = #tpu.dot_dimension_numbers<[1], [0], [0], [1], [0, 0, 1, 1], [], []>} : vector<128x8xbf16>, vector<8x32xbf16>, vector<128x32xf32> -> vector<128x32xf32>
      %c0_17 = arith.constant 0 : index
      %c0_18 = arith.constant 0 : index
      %19 = vector.load %arg6[%c0_17, %c0_18] : memref<1x32xf32, #tpu.memory_space<vmem>>, vector<1x32xf32>
      %20 = vector.broadcast %19 : vector<1x32xf32> to vector<128x32xf32>
      %21 = arith.addf %18, %20 : vector<128x32xf32>
      %cst_19 = arith.constant 0.000000e+00 : f32
      %22 = vector.broadcast %cst_19 : f32 to vector<128x32xf32>
      %23 = arith.maximumf %21, %22 : vector<128x32xf32>
      %24 = arith.truncf %23 : vector<128x32xf32> to vector<128x32xbf16>
      %c0_20 = arith.constant 0 : index
      %c0_21 = arith.constant 0 : index
      %25 = vector.load %arg7[%c0_20, %c0_21] : memref<128x32xbf16, #tpu.memory_space<vmem>>, vector<128x32xbf16>
      tpu.vector_store %arg7[%c0_20, %c0_21], %24 {strides = array<i32>} : memref<128x32xbf16, #tpu.memory_space<vmem>>, vector<128x32xbf16>,
    } else {
    }
    return
  }
  func.func @transform_0(%arg0: i32, %arg1: i32) -> (i32, i32) {
    %c0_i32 = arith.constant 0 : i32
    return %arg0, %arg1 : i32, i32
  }
  func.func @transform_1(%arg0: i32, %arg1: i32) -> (i32, i32) {
    %c0_i32 = arith.constant 0 : i32
    %c0_i32_0 = arith.constant 0 : i32
    return %arg1, %c0_i32 : i32, i32
  }
  func.func @transform_2(%arg0: i32, %arg1: i32) -> (i32, i32) {
    %c0_i32 = arith.constant 0 : i32
    %c0_i32_0 = arith.constant 0 : i32
    return %arg0, %c0_i32 : i32, i32
  }
  func.func @transform_3(%arg0: i32, %arg1: i32) -> (i32, i32) {
    %c0_i32 = arith.constant 0 : i32
    %c0_i32_0 = arith.constant 0 : i32
    %c0_i32_1 = arith.constant 0 : i32
    return %c0_i32, %c0_i32_0 : i32, i32
  }
  func.func @transform_4(%arg0: i32, %arg1: i32) -> (i32, i32) {
    %c0_i32 = arith.constant 0 : i32
    %c0_i32_0 = arith.constant 0 : i32
    %c0_i32_1 = arith.constant 0 : i32
    return %c0_i32, %c0_i32_0 : i32, i32
  }
  func.func @transform_5(%arg0: i32, %arg1: i32) -> (i32, i32) {
    %c0_i32 = arith.constant 0 : i32
    %c0_i32_0 = arith.constant 0 : i32
    return %arg0, %c0_i32 : i32, i32
  }
}

</mosaic_0001>

<bundles_post_ra>
// kernel: tpu_custom_call.1
= control target key start
LH: loop header
LB: loop body
LE: loop exit
PB: predicated region body
PF: predicated region fallthrough
CT: control target
= control target key end

     0   :  { %s1571_s18 = smov 0   ;;  %s1573_s19 = smov 0   ;;  %s1833_s0 = inlined_call_operand.vmem [shape: bf16[256,256], index: 0, kind: input, shape index: {}]   ;;  %s1834_s1 = inlined_call_operand.vmem [shape: bf16[256,4], index: 1, kind: input, shape index: {}]   ;;  %s1835_s2 = inlined_call_operand.vmem [shape: bf16[256,4], index: 2, kind: input, shape index: {}]   ;;  %s1836_s3 = inlined_call_operand.vmem [shape: bf16[8,32], index: 3, kind: input, shape index: {}]   ;;  %s1837_s4 = inlined_call_operand.vmem [shape: f32[1,32], index: 4, kind: input, shape index: {}]   ;;  %s1838_s5 = inlined_call_operand.vmem [shape: bf16[256,32], index: 5, kind: output, shape index: {}]  }
   0x1   :  { %s1575_s20 = smov 0   ;;  %s1577_s21 = smov 0  }
   0x2   :  { %s1579_s22 = smov 0   ;;  %s1581_s23 = smov 0  }
   0x3   :  { %s1583_s24 = smov 0  }
   0x4 LB: > { %s24_s25 = sadd.s32 1, %s1529_s22  ;;  %s27_s26 = sadd.s32 1, %s1533_s23  ;;  %s1537_s24 = sphi %s1583_s24, %s15_s24   ;;  %s1533_s23 = sphi %s1581_s23, %s1844_s23   ;;  %s1529_s22 = sphi %s1579_s22, %s1843_s22   ;;  %s1525_s21 = sphi %s1577_s21, %s1842_s21   ;;  %s1521_s20 = sphi %s1575_s20, %s1841_s20   ;;  %s1517_s19 = sphi %s1573_s19, %s1840_s19   ;;  %s1513_s18 = sphi %s1571_s18, %s1839_s18  }
   0x5   : > { %p25_p0 = scmp.ge.s32.totalorder %s24_s25, 2  ;;  %p43_p1 = scmp.ne.s32.totalorder %s1517_s19, %s1513_s18 }
   0x6   : > { %p44_p2 = scmp.eq.s32.totalorder %s1537_s24, 0  ;;  %s36_s30 = sadd.s32 1, %s1517_s19 }
   0x7   : > { %s1846_s25 = smov (%p25_p0, %s24_s25), 0  ;;  %s1848_s26 = smov (!%p25_p0, %s27_s26), %s1533_s23 }
   0x8   : > { %p45_p3 = por %p44_p2, %p43_p1  ;;  %p29_p4 = scmp.ge.s32.totalorder %s1848_s26, 2 }
   0x9   : > { %s32_s27 = ssub.s32 %s1529_s22, %s1846_s25  ;;  %p1160_p6 = scmp.ge.s32.totalorder %s1537_s24, 4 }
   0xa   : > { %s1850_s26 = smov (%p29_p4, %s1848_s26), 0 }
   0xb   : > { %s31_s28 = ssub.s32 %s1533_s23, %s1850_s26  ;;  %195 = sbr.rel (%p1160_p6) target bundleno = 34 (0x22), region = 24 }
   0xc   : > { %s33_s29 = sor.u32 %s32_s27, %s31_s28 }
   0xd   : > { %p34_p5 = scmp.eq.s32.totalorder %s33_s29, 0 }
   0xf   : > { %s1622_s6 = scalar_select %p34_p5, %s1517_s19, %s36_s30  }
  0x12   : > { %198 = sbr.rel (!%p45_p3) target bundleno = 34 (0x22), region = 28  ;;  %s200_s7 = sand.u32 (%p45_p3), 1, %s1517_s19  }
  0x13   : > { %s1218_s8 = sshll.u32 (%p45_p3), %s1533_s23, 5  ;;  %s1161_s9 = sshll.u32 (%p45_p3), %s200_s7, 6 }
  0x14   : > { %s205_s10 = sadd.s32 (%p45_p3), %s1529_s22, %s1218_s8  ;;  %s202_s15 = scalar_lea.vmem (%p45_p3), [#allocation3], %s1161_s9 }
  0x15   : > { %s1164_s11 = sshll.u32 (%p45_p3), %s205_s10, 2 }
  0x16   : > { %s1631_s14 = scalar_lea.vmem (%p45_p3), %s1833_s0, %s1164_s11 }
  0x17   : > { %v223_v0 = vld [vmem:[%s1631_s14] sm:$0xf] (%p45_p3)  ;;  %v225_v1 = vld [vmem:[%s1631_s14 + $0x8] sm:$0xf] (%p45_p3)  ;;  %v227_v2 = vld [vmem:[%s1631_s14 + $0x10] sm:$0xf] (%p45_p3) }
  0x18   : > { %224 = vst [vmem:[%s202_s15] sm:$0xf] (%p45_p3), %v223_v0  ;;  %226 = vst [vmem:[%s202_s15 + $0x4] sm:$0xf] (%p45_p3), %v225_v1  ;;  %v229_v3 = vld [vmem:[%s1631_s14 + $0x18] sm:$0xf] (%p45_p3) }
  0x19   : > { %228 = vst [vmem:[%s202_s15 + $0x8] sm:$0xf] %v227_v2  ;;  %v231_v4 = vld [vmem:[%s1631_s14 + $0x20] sm:$0xf]  ;;  %v233_v5 = vld [vmem:[%s1631_s14 + $0x28] sm:$0xf] }
  0x1a   : > { %230 = vst [vmem:[%s202_s15 + $0xc] sm:$0xf] %v229_v3  ;;  %232 = vst [vmem:[%s202_s15 + $0x10] sm:$0xf] %v231_v4  ;;  %v235_v6 = vld [vmem:[%s1631_s14 + $0x30] sm:$0xf] }
  0x1b   : > { %234 = vst [vmem:[%s202_s15 + $0x14] sm:$0xf] %v233_v5  ;;  %v237_v7 = vld [vmem:[%s1631_s14 + $0x38] sm:$0xf]  ;;  %v239_v8 = vld [vmem:[%s1631_s14 + $0x40] sm:$0xf] }
  0x1c   : > { %236 = vst [vmem:[%s202_s15 + $0x18] sm:$0xf] %v235_v6  ;;  %238 = vst [vmem:[%s202_s15 + $0x1c] sm:$0xf] %v237_v7  ;;  %v241_v9 = vld [vmem:[%s1631_s14 + $0x48] sm:$0xf] }
  0x1d   : > { %240 = vst [vmem:[%s202_s15 + $0x20] sm:$0xf] %v239_v8  ;;  %v243_v10 = vld [vmem:[%s1631_s14 + $0x50] sm:$0xf]  ;;  %v245_v11 = vld [vmem:[%s1631_s14 + $0x58] sm:$0xf] }
  0x1e   : > { %242 = vst [vmem:[%s202_s15 + $0x24] sm:$0xf] %v241_v9  ;;  %244 = vst [vmem:[%s202_s15 + $0x28] sm:$0xf] %v243_v10  ;;  %v247_v12 = vld [vmem:[%s1631_s14 + $0x60] sm:$0xf] }
  0x1f   : > { %246 = vst [vmem:[%s202_s15 + $0x2c] sm:$0xf] %v245_v11  ;;  %v249_v13 = vld [vmem:[%s1631_s14 + $0x68] sm:$0xf]  ;;  %v251_v14 = vld [vmem:[%s1631_s14 + $0x70] sm:$0xf] }
  0x20   : > { %248 = vst [vmem:[%s202_s15 + $0x30] sm:$0xf] %v247_v12  ;;  %250 = vst [vmem:[%s202_s15 + $0x34] sm:$0xf] %v249_v13  ;;  %v253_v15 = vld [vmem:[%s1631_s14 + $0x78] sm:$0xf] }
  0x21   : > { %252 = vst [vmem:[%s202_s15 + $0x38] sm:$0xf] %v251_v14  ;;  %254 = vst [vmem:[%s202_s15 + $0x3c] sm:$0xf] %v253_v15 }
  0x22 PF: > { %p1165_p7 = scmp.ge.s32.totalorder %s1537_s24, 1  ;;  %p326_p8 = scmp.lt.s32.totalorder %s1537_s24, 5 }
  0x24   : > { %p327_p9 = pnand %p1165_p7, %p326_p8 }
  0x25   : > { %s333_s16 = sand.u32 (!%p327_p9), 1, %s1513_s18   ;;  %s1167_s17 = sshll.u32 (!%p327_p9), %s1521_s20, 4 }
  0x26   : > { %330 = sbr.rel (%p327_p9) target bundleno = 663 (0x297), region = 77  ;;  %s1166_s27 = sshll.u32 (!%p327_p9), %s333_s16, 6 }
  0x27   : > { %p372_p10 = scmp.lt.s32.totalorder (!%p327_p9), %s1167_s17, 31  ;;  %s1169_s28 = sshll.u32 (!%p327_p9), %s1525_s21, 4 }
  0x28   : > { %p378_p11 = scmp.lt.s32.totalorder (!%p327_p9), %s1169_s28, 31  ;;  %s1669_s21 = scalar_lea.vmem (!%p327_p9), [#allocation3], %s1166_s27 }
  0x29   : > { %p1173_p12 = scmp.ne.s32.totalorder (!%p327_p9), %s1521_s20, 0 }
  0x2d   : > { %s1852_s17 = smov (!%p372_p10, %s1167_s17), 31  ;;  %s1854_s28 = smov (!%p378_p11, %s1169_s28), 31 }
  0x2e   : > { %s1168_s29 = sshll.u32 %s1852_s17, 2  ;;  %s1170_s9 = sshll.u32 %s1854_s28, 2  ;;  %vm394_vm0 = vcmask (!%p1173_p12), 64512   ;;  %v1539_v16 = vmov (!%p1173_p12), 0.0  }
  0x2f   : > { %s1657_s8 = scalar_lea.vmem %s1834_s1, %s1168_s29  ;;  %s1662_s12 = scalar_lea.vmem %s1835_s2, %s1170_s9  ;;  %395 = vst.msk [vmem:[#allocation2] sm:$0xff] (!%p1173_p12), %vm394_vm0, %v1539_v16  ;;  %396 = vst.msk [vmem:[#allocation2 + $0x8] sm:$0xff] (!%p1173_p12), %vm394_vm0, %v1539_v16 }
  0x30   : > { %s1667_s14 = scalar_lea.vmem %s1838_s5, %s1170_s9  ;;  %393 = sbr.rel (%p1173_p12) target bundleno = 55 (0x37), region = 85  ;;  %397 = vst.msk [vmem:[#allocation2 + $0x10] sm:$0xff] (!%p1173_p12), %vm394_vm0, %v1539_v16  ;;  %398 = vst.msk [vmem:[#allocation2 + $0x18] sm:$0xff] (!%p1173_p12), %vm394_vm0, %v1539_v16 }
  0x31   : > { %399 = vst.msk [vmem:[#allocation2 + $0x20] sm:$0xff] (!%p1173_p12), %vm394_vm0, %v1539_v16  ;;  %400 = vst.msk [vmem:[#allocation2 + $0x28] sm:$0xff] (!%p1173_p12), %vm394_vm0, %v1539_v16 }
  0x32   : > { %401 = vst.msk [vmem:[#allocation2 + $0x30] sm:$0xff] (!%p1173_p12), %vm394_vm0, %v1539_v16  ;;  %402 = vst.msk [vmem:[#allocation2 + $0x38] sm:$0xff] (!%p1173_p12), %vm394_vm0, %v1539_v16 }
  0x33   : > { %403 = vst.msk [vmem:[#allocation2 + $0x40] sm:$0xff] (!%p1173_p12), %vm394_vm0, %v1539_v16  ;;  %404 = vst.msk [vmem:[#allocation2 + $0x48] sm:$0xff] (!%p1173_p12), %vm394_vm0, %v1539_v16 }
  0x34   : > { %405 = vst.msk [vmem:[#allocation2 + $0x50] sm:$0xff] (!%p1173_p12), %vm394_vm0, %v1539_v16  ;;  %406 = vst.msk [vmem:[#allocation2 + $0x58] sm:$0xff] (!%p1173_p12), %vm394_vm0, %v1539_v16 }
  0x35   : > { %407 = vst.msk [vmem:[#allocation2 + $0x60] sm:$0xff] (!%p1173_p12), %vm394_vm0, %v1539_v16  ;;  %408 = vst.msk [vmem:[#allocation2 + $0x68] sm:$0xff] (!%p1173_p12), %vm394_vm0, %v1539_v16 }
  0x36   : > { %409 = vst.msk [vmem:[#allocation2 + $0x70] sm:$0xff] (!%p1173_p12), %vm394_vm0, %v1539_v16  ;;  %410 = vst.msk [vmem:[#allocation2 + $0x78] sm:$0xff] (!%p1173_p12), %vm394_vm0, %v1539_v16 }
  0x37 PF: > { %v1427_v17 = vld [vmem:[%s1657_s8] sm:$0xff]   ;;  %v1428_v18 = vld [vmem:[%s1657_s8 + $0x8] sm:$0xff]   ;;  %v1429_v19 = vld [vmem:[%s1657_s8 + $0x10] sm:$0xff]   ;;  %vm668_vm1 = vcmask 31744   ;;  %p1190_p13 = scmp.ne.s32.totalorder %s1521_s20, 1 }
  0x38   : > { %1299 = vmatprep.subr.bf16.mxu0 %v1427_v17  ;;  %1349 = vmatprep.subr.bf16.mxu1 %v1427_v17  ;;  %v1430_v20 = vld [vmem:[%s1657_s8 + $0x18] sm:$0xff]   ;;  %v1435_v21 = vld [vmem:[%s1669_s21] sm:$0xff]   ;;  %v1432_v24 = vld [vmem:[%s1657_s8 + $0x28] sm:$0xff]   ;;  %vm859_vm2 = vcmask (!%p1190_p13), 1043456   ;;  %s1540_s16 = smov (!%p1190_p13), 4   ;;  %vm785_vm3 = vcmask (!%p1190_p13), 64544  }
  0x39   : > { %1300 = vmatpush3.bf16.msra.mxu0 %v1427_v17  ;;  %1357 = vmatpush3.bf16.msra.mxu1 %v1427_v17  ;;  %v1436_v22 = vld [vmem:[%s1669_s21 + $0x20] sm:$0xff]   ;;  %v1433_v25 = vld [vmem:[%s1657_s8 + $0x30] sm:$0xff]   ;;  %v1434_v26 = vld [vmem:[%s1657_s8 + $0x38] sm:$0xff]   ;;  %vm834_vm4 = vcmask (!%p1190_p13), 64512   ;;  %vm1040_vm5 = vcmask (!%p1190_p13), 257024  }
  0x3a   : > { %1301 = vmatprep.subr.bf16.mxu0 %v1428_v18  ;;  %1350 = vmatprep.subr.bf16.mxu1 %v1428_v18  ;;  %v1431_v23 = vld [vmem:[%s1657_s8 + $0x20] sm:$0xff]   ;;  %v1437_v27 = vld [vmem:[%s1669_s21 + $0x8] sm:$0xff]   ;;  %v1439_v29 = vld [vmem:[%s1669_s21 + $0x10] sm:$0xff]  }
  0x3b   : > { %1315 = vmatprep.mubr.bf16.mxu0 %v1435_v21  ;;  %1323 = vmatprep.mubr.bf16.mxu1 %v1436_v22  ;;  %v1438_v28 = vld [vmem:[%s1669_s21 + $0x28] sm:$0xff]   ;;  %v1440_v30 = vld [vmem:[%s1669_s21 + $0x30] sm:$0xff]   ;;  %v1441_v31 = vld [vmem:[%s1669_s21 + $0x18] sm:$0xff]  }
  0x3c   : > { %v1442_v32 = vld [vmem:[%s1669_s21 + $0x38] sm:$0xff]   ;;  %v413_v33 = vld [vmem:[#allocation2 + $0x10] sm:$0xff]  ;;  %v411_v35 = vld [vmem:[#allocation2] sm:$0xff] }
  0x3d   : > { %1302 = vmatpush3.bf16.msra.mxu0 %v1428_v18  ;;  %1358 = vmatpush3.bf16.msra.mxu1 %v1428_v18  ;;  %v421_v34 = vld [vmem:[#allocation2 + $0x50] sm:$0xff]  ;;  %v419_v36 = vld [vmem:[#allocation2 + $0x40] sm:$0xff]  ;;  %v414_v39 = vld [vmem:[#allocation2 + $0x18] sm:$0xff] }
  0x3e   : > { %1303 = vmatprep.subr.bf16.mxu0 %v1429_v19  ;;  %1351 = vmatprep.subr.bf16.mxu1 %v1429_v19  ;;  %v422_v40 = vld [vmem:[#allocation2 + $0x58] sm:$0xff]  ;;  %v412_v45 = vld [vmem:[#allocation2 + $0x8] sm:$0xff]  ;;  %v417_v57 = vld [vmem:[#allocation2 + $0x30] sm:$0xff] }
  0x3f   : > { %v420_v46 = vld [vmem:[#allocation2 + $0x48] sm:$0xff]  ;;  %v425_v58 = vld [vmem:[#allocation2 + $0x70] sm:$0xff]  ;;  %v415_v59 = vld [vmem:[#allocation2 + $0x20] sm:$0xff] }
  0x40   : > { %v423_v60 = vld [vmem:[#allocation2 + $0x60] sm:$0xff]  ;;  %v418_v63 = vld [vmem:[#allocation2 + $0x38] sm:$0xff]  ;;  %v416_v5 = vld [vmem:[#allocation2 + $0x28] sm:$0xff] }
  0x41   : > { %1304 = vmatpush3.bf16.msra.mxu0 %v1429_v19  ;;  %1359 = vmatpush3.bf16.msra.mxu1 %v1429_v19  ;;  %v426_v0 = vld [vmem:[#allocation2 + $0x78] sm:$0xff]  ;;  %v424_v6 = vld [vmem:[#allocation2 + $0x68] sm:$0xff]  ;;  %v1236_v17 = vld [vmem:[%s1662_s12] sm:$0xff] (!%p1190_p13)  }
  0x42   : > { %1305 = vmatprep.subr.bf16.mxu0 %v1430_v20  ;;  %1352 = vmatprep.subr.bf16.mxu1 %v1430_v20  ;;  %v1267_v18 = vld [vmem:[%s1662_s12 + $0x8] sm:$0xff] (!%p1190_p13)   ;;  %v1270_v19 = vld [vmem:[%s1662_s12 + $0x20] sm:$0xff] (!%p1190_p13)   ;;  %v1238_v21 = vunpack.c.h.bf16 (!%p1190_p13), %v1236_v17 }
  0x43   : > { %v1241_v22 = vunpack.c.l.bf16 (!%p1190_p13), %v1267_v18 }
  0x45   : > { %1306 = vmatpush3.bf16.msra.mxu0 %v1430_v20  ;;  %1360 = vmatpush3.bf16.msra.mxu1 %v1430_v20  ;;  %v1237_v20 = vunpack.c.l.bf16 (!%p1190_p13), %v1236_v17 }
  0x46   : > { %1307 = vmatprep.subr.bf16.mxu0 %v1431_v23  ;;  %1353 = vmatprep.subr.bf16.mxu1 %v1431_v23 }
  0x49   : > { %1308 = vmatpush3.bf16.msra.mxu0 %v1431_v23  ;;  %1361 = vmatpush3.bf16.msra.mxu1 %v1431_v23  ;;  %v1242_v23 = vunpack.c.h.bf16 (!%p1190_p13), %v1267_v18 }
  0x4a   : > { %1309 = vmatprep.subr.bf16.mxu0 %v1432_v24  ;;  %1354 = vmatprep.subr.bf16.mxu1 %v1432_v24 }
  0x4d   : > { %1310 = vmatpush3.bf16.msra.mxu0 %v1432_v24  ;;  %1362 = vmatpush3.bf16.msra.mxu1 %v1432_v24  ;;  %v1271_v24 = vld [vmem:[%s1662_s12 + $0x28] sm:$0xff] (!%p1190_p13)  }
  0x4e   : > { %1311 = vmatprep.subr.bf16.mxu0 %v1433_v25  ;;  %1355 = vmatprep.subr.bf16.mxu1 %v1433_v25 }
  0x51   : > { %1312 = vmatpush3.bf16.msra.mxu0 %v1433_v25  ;;  %1363 = vmatpush3.bf16.msra.mxu1 %v1433_v25  ;;  %v1268_v25 = vld [vmem:[%s1662_s12 + $0x10] sm:$0xff] (!%p1190_p13)  }
  0x52   : > { %1313 = vmatprep.subr.bf16.mxu0 %v1434_v26  ;;  %1356 = vmatprep.subr.bf16.mxu1 %v1434_v26 }
  0x55   : > { %1314 = vmatpush3.bf16.msra.mxu0 %v1434_v26  ;;  %1364 = vmatpush3.bf16.msra.mxu1 %v1434_v26  ;;  %v1253_v26 = vunpack.c.l.bf16 (!%p1190_p13), %v1270_v19 }
  0x58   : > { %1316 = vmatmul.mubr.bf16.vlgmr.msra.gmra.mrb[0].mxu0 %v1437_v27  ;;  %1324 = vmatmul.mubr.bf16.vlgmr.msra.gmra.mrb[0].mxu1 %v1438_v28  ;;  %v1254_v27 = vunpack.c.h.bf16 (!%p1190_p13), %v1270_v19  ;;  %v1257_v28 = vunpack.c.l.bf16 (!%p1190_p13), %v1271_v24 }
  0x59   : > { %1319 = vmatprep.mubr.bf16.mxu0 %v1439_v29  ;;  %1327 = vmatprep.mubr.bf16.mxu1 %v1440_v30  ;;  %v1258_v29 = vunpack.c.h.bf16 (!%p1190_p13), %v1271_v24  ;;  %v1272_v30 = vld [vmem:[%s1662_s12 + $0x30] sm:$0xff] (!%p1190_p13)  }
  0x60   : > { %1320 = vmatmul.mubr.bf16.gmra.mrb[4].mxu0 %v1441_v31  ;;  %1328 = vmatmul.mubr.bf16.gmra.mrb[4].mxu1 %v1442_v32  ;;  %v826_v31 = vld [vmem:[%s1836_s3] sm:$0xf] (!%p1190_p13)  ;;  %v1443_v32 = vpack.i.bf16 (!%p1190_p13), %v1238_v21, %v1237_v20 }
  0x61   : > { %1367 = vmatprep.subr.msk.bf16.mxu0 (!%p1190_p13), %vm859_vm2, %v826_v31  ;;  %1368 = vmatprep.subr.msk.bf16.mxu1 (!%p1190_p13), %vm859_vm2, %v826_v31 }
  0x62   : > { %1444 = vrot.lane.b32.xlu0 (!%p1190_p13), %v1443_v32, %s1540_s16 }
 0x12b   : > { %v1317_v37 = vpop.f32.mrb[0].mxu0  ;;  %v1325_v38 = vpop.f32.mrb[0].mxu1 }
 0x12c   : > { %v654_v41 = vadd.f32 %v1317_v37, %v413_v33  ;;  %v662_v42 = vadd.f32 %v1325_v38, %v421_v34  ;;  %v589_v43 = vpop.f32.mrb[1].mxu0  ;;  %v621_v44 = vpop.f32.mrb[1].mxu1  ;;  %v1453_v33 = vpack.i.bf16 (!%p1190_p13), %v1242_v23, %v1241_v22  ;;  %v1245_v34 = vunpack.c.l.bf16 (!%p1190_p13), %v1268_v25 }
 0x12d   : > { %v652_v47 = vadd.f32 %v589_v43, %v411_v35  ;;  %v660_v48 = vadd.f32 %v621_v44, %v419_v36  ;;  %v1318_v49 = vpop.f32.mrb[2].mxu0  ;;  %v1326_v50 = vpop.f32.mrb[2].mxu1  ;;  %v1246_v35 = vunpack.c.h.bf16 (!%p1190_p13), %v1268_v25  ;;  %v1448_v36 = vpack.i.bf16 (!%p1190_p13), %v1254_v27, %v1253_v26 }
 0x12e   : > { %671 = vst.msk [vmem:[#allocation2 + $0x10] sm:$0xff] %vm668_vm1, %v654_v41  ;;  %679 = vst.msk [vmem:[#allocation2 + $0x50] sm:$0xff] %vm668_vm1, %v662_v42  ;;  %v655_v51 = vadd.f32 %v1318_v49, %v414_v39  ;;  %v663_v52 = vadd.f32 %v1326_v50, %v422_v40  ;;  %v592_v53 = vpop.f32.mrb[3].mxu0  ;;  %v624_v54 = vpop.f32.mrb[3].mxu1  ;;  %1454 = vrot.lane.b32.xlu1 (!%p1190_p13), %v1453_v33, %s1540_s16  ;;  %v1458_v37 = vpack.i.bf16 (!%p1190_p13), %v1258_v29, %v1257_v28  ;;  %v1269_v40 = vld [vmem:[%s1662_s12 + $0x18] sm:$0xff] (!%p1190_p13)  }
 0x12f   : > { %669 = vst.msk [vmem:[#allocation2] sm:$0xff] %vm668_vm1, %v652_v47  ;;  %677 = vst.msk [vmem:[#allocation2 + $0x40] sm:$0xff] %vm668_vm1, %v660_v48  ;;  %v653_v55 = vadd.f32 %v592_v53, %v412_v45  ;;  %v661_v56 = vadd.f32 %v624_v54, %v420_v46  ;;  %v1261_v38 = vunpack.c.l.bf16 (!%p1190_p13), %v1272_v30  ;;  %v1262_v39 = vunpack.c.h.bf16 (!%p1190_p13), %v1272_v30  ;;  %v1273_v41 = vld [vmem:[%s1662_s12 + $0x38] sm:$0xff] (!%p1190_p13)   ;;  %1449 = vrot.lane.b32.xlu0 (!%p1190_p13), %v1448_v36, %s1540_s16 }
 0x130   : > { %672 = vst.msk [vmem:[#allocation2 + $0x18] sm:$0xff] %vm668_vm1, %v655_v51  ;;  %680 = vst.msk [vmem:[#allocation2 + $0x58] sm:$0xff] %vm668_vm1, %v663_v52  ;;  %v861_v42 = vsel (!%p1190_p13), %vm859_vm2, %v826_v31, 0  ;;  %v1463_v43 = vpack.i.bf16 (!%p1190_p13), %v1246_v35, %v1245_v34  ;;  %v1249_v44 = vunpack.c.l.bf16 (!%p1190_p13), %v1269_v40  ;;  %v1250_v46 = vunpack.c.h.bf16 (!%p1190_p13), %v1269_v40  ;;  %v1445_v51 = vpop.permute.xlu0 (!%p1190_p13), %1444  ;;  %v1762_v35 = vld [vmem:[%s1837_s4] ss:$0 sm:$0xff] (!%p1190_p13) }
 0x131   : > { %670 = vst.msk [vmem:[#allocation2 + $0x8] sm:$0xff] %vm668_vm1, %v653_v55  ;;  %678 = vst.msk [vmem:[#allocation2 + $0x48] sm:$0xff] %vm668_vm1, %v661_v56  ;;  %1332 = vmatpush3.bf16.msra.mxu0 (!%p1190_p13), %v861_v42  ;;  %1366 = vmatpush3.bf16.msra.mxu1 (!%p1190_p13), %v861_v42  ;;  %v1468_v45 = vpack.i.bf16 (!%p1190_p13), %v1262_v39, %v1261_v38  ;;  %v1265_v47 = vunpack.c.l.bf16 (!%p1190_p13), %v1273_v41  ;;  %v1266_v48 = vunpack.c.h.bf16 (!%p1190_p13), %v1273_v41  ;;  %v1447_v53 = vunpack.i.h.bf16 (!%p1190_p13), %v1445_v51 }
 0x132   : > { %1459 = vrot.lane.b32.xlu1 (!%p1190_p13), %v1458_v37, %s1540_s16  ;;  %v1473_v49 = vpack.i.bf16 (!%p1190_p13), %v1250_v46, %v1249_v44  ;;  %v1446_v54 = vunpack.i.l.bf16 (!%p1190_p13), %v1445_v51 }
 0x133   : > { %v1321_v61 = vpop.f32.mrb[4].mxu0  ;;  %v1329_v62 = vpop.f32.mrb[4].mxu1  ;;  %688 = sbr.rel (%p1190_p13) target bundleno = 663 (0x297), region = 89  ;;  %1464 = vrot.lane.b32.xlu0 (!%p1190_p13), %v1463_v43, %s1540_s16  ;;  %v1478_v50 = vpack.i.bf16 (!%p1190_p13), %v1266_v48, %v1265_v47  ;;  %787 = vst.msk [vmem:[#allocation2 + $0x8] sm:$0xff] (!%p1190_p13), %vm785_vm3, %v1447_v53 }
 0x134   : > { %v658_v1 = vadd.f32 %v1321_v61, %v417_v57  ;;  %v666_v2 = vadd.f32 %v1329_v62, %v425_v58  ;;  %v605_v3 = vpop.f32.mrb[5].mxu0  ;;  %v637_v4 = vpop.f32.mrb[5].mxu1  ;;  %786 = vst.msk [vmem:[#allocation2] sm:$0xff] (!%p1190_p13), %vm785_vm3, %v1446_v54 }
 0x135   : > { %v656_v7 = vadd.f32 %v605_v3, %v415_v59  ;;  %v664_v8 = vadd.f32 %v637_v4, %v423_v60  ;;  %v1322_v9 = vpop.f32.mrb[6].mxu0  ;;  %v1330_v10 = vpop.f32.mrb[6].mxu1 }
 0x136   : > { %675 = vst.msk [vmem:[#allocation2 + $0x30] sm:$0xff] %vm668_vm1, %v658_v1  ;;  %683 = vst.msk [vmem:[#allocation2 + $0x70] sm:$0xff] %vm668_vm1, %v666_v2  ;;  %v659_v11 = vadd.f32 %v1322_v9, %v418_v63  ;;  %v667_v12 = vadd.f32 %v1330_v10, %v426_v0  ;;  %v608_v13 = vpop.f32.mrb[7].mxu0  ;;  %v640_v14 = vpop.f32.mrb[7].mxu1  ;;  %1469 = vrot.lane.b32.xlu1 (!%p1190_p13), %v1468_v45, %s1540_s16 }
 0x137   : > { %673 = vst.msk [vmem:[#allocation2 + $0x20] sm:$0xff] %vm668_vm1, %v656_v7  ;;  %681 = vst.msk [vmem:[#allocation2 + $0x60] sm:$0xff] %vm668_vm1, %v664_v8  ;;  %v657_v15 = vadd.f32 %v608_v13, %v416_v5  ;;  %v665_v16 = vadd.f32 %v640_v14, %v424_v6  ;;  %1474 = vrot.lane.b32.xlu0 (!%p1190_p13), %v1473_v49, %s1540_s16 }
 0x138   : > { %676 = vst.msk [vmem:[#allocation2 + $0x38] sm:$0xff] %vm668_vm1, %v659_v11  ;;  %684 = vst.msk [vmem:[#allocation2 + $0x78] sm:$0xff] %vm668_vm1, %v667_v12 }
 0x139   : > { %674 = vst.msk [vmem:[#allocation2 + $0x28] sm:$0xff] %vm668_vm1, %v657_v15  ;;  %682 = vst.msk [vmem:[#allocation2 + $0x68] sm:$0xff] %vm668_vm1, %v665_v16 }
 0x13a   : > { %1479 = vrot.lane.b32.xlu1 %v1478_v50, %s1540_s16  ;;  %v803_v6 = vld [vmem:[#allocation2 + $0x8] sm:$0xff] }
 0x13b   : > { %v802_v5 = vld [vmem:[#allocation2] sm:$0xff] }
 0x13c   : > { %v818_v8 = vpack.c.bf16 %v803_v6, %v802_v5 }
 0x13e   : > { %1333 = vmatprep.mubr.msk.bf16.mxu0 %vm834_vm4, %v818_v8 }
 0x1a0   : > { %v1455_v52 = vpop.permute.xlu1 %1454 }
 0x1a1   : > { %v1457_v55 = vunpack.i.h.bf16 %v1455_v52  ;;  %v1456_v56 = vunpack.i.l.bf16 %v1455_v52  ;;  %v1450_v57 = vpop.permute.xlu0 %1449 }
 0x1a2   : > { %v1452_v59 = vunpack.i.h.bf16 %v1450_v57  ;;  %v1451_v60 = vunpack.i.l.bf16 %v1450_v57 }
 0x1a3   : > { %789 = vst.msk [vmem:[#allocation2 + $0x18] sm:$0xff] %vm785_vm3, %v1457_v55  ;;  %788 = vst.msk [vmem:[#allocation2 + $0x10] sm:$0xff] %vm785_vm3, %v1456_v56 }
 0x1a4   : > { %v1460_v58 = vpop.permute.xlu1 %1459  ;;  %795 = vst.msk [vmem:[#allocation2 + $0x48] sm:$0xff] %vm785_vm3, %v1452_v59  ;;  %794 = vst.msk [vmem:[#allocation2 + $0x40] sm:$0xff] %vm785_vm3, %v1451_v60 }
 0x1a5   : > { %v1462_v61 = vunpack.i.h.bf16 %v1460_v58  ;;  %v1461_v62 = vunpack.i.l.bf16 %v1460_v58  ;;  %v1465_v63 = vpop.permute.xlu0 %1464 }
 0x1a6   : > { %v1467_v1 = vunpack.i.h.bf16 %v1465_v63  ;;  %v1466_v2 = vunpack.i.l.bf16 %v1465_v63 }
 0x1a7   : > { %797 = vst.msk [vmem:[#allocation2 + $0x58] sm:$0xff] %vm785_vm3, %v1462_v61  ;;  %796 = vst.msk [vmem:[#allocation2 + $0x50] sm:$0xff] %vm785_vm3, %v1461_v62 }
 0x1a8   : > { %v1470_v0 = vpop.permute.xlu1 %1469  ;;  %791 = vst.msk [vmem:[#allocation2 + $0x28] sm:$0xff] %vm785_vm3, %v1467_v1  ;;  %790 = vst.msk [vmem:[#allocation2 + $0x20] sm:$0xff] %vm785_vm3, %v1466_v2 }
 0x1a9   : > { %v1472_v3 = vunpack.i.h.bf16 %v1470_v0  ;;  %v1471_v4 = vunpack.i.l.bf16 %v1470_v0  ;;  %v1475_v10 = vpop.permute.xlu0 %1474 }
 0x1aa   : > { %v804_v7 = vld [vmem:[#allocation2 + $0x10] sm:$0xff]  ;;  %v805_v9 = vld [vmem:[#allocation2 + $0x18] sm:$0xff]  ;;  %v1477_v13 = vunpack.i.h.bf16 %v1475_v10  ;;  %v1476_v14 = vunpack.i.l.bf16 %v1475_v10 }
 0x1ab   : > { %799 = vst.msk [vmem:[#allocation2 + $0x68] sm:$0xff] %vm785_vm3, %v1472_v3  ;;  %798 = vst.msk [vmem:[#allocation2 + $0x60] sm:$0xff] %vm785_vm3, %v1471_v4  ;;  %v819_v12 = vpack.c.bf16 %v805_v9, %v804_v7  ;;  %v810_v17 = vld [vmem:[#allocation2 + $0x40] sm:$0xff]  ;;  %v811_v18 = vld [vmem:[#allocation2 + $0x48] sm:$0xff] }
 0x1ac   : > { %v1480_v11 = vpop.permute.xlu1 %1479  ;;  %793 = vst.msk [vmem:[#allocation2 + $0x38] sm:$0xff] %vm785_vm3, %v1477_v13  ;;  %792 = vst.msk [vmem:[#allocation2 + $0x30] sm:$0xff] %vm785_vm3, %v1476_v14  ;;  %v822_v20 = vpack.c.bf16 %v811_v18, %v810_v17 }
 0x1ad   : > { %v1482_v15 = vunpack.i.h.bf16 %v1480_v11  ;;  %v1481_v16 = vunpack.i.l.bf16 %v1480_v11  ;;  %1334 = vmatmul.mubr.msk.bf16.vlgmr.msra.gmra.mrb[0].mxu0 %vm834_vm4, %v819_v12 }
 0x1ae   : > { %v812_v19 = vld [vmem:[#allocation2 + $0x50] sm:$0xff]  ;;  %v813_v21 = vld [vmem:[#allocation2 + $0x58] sm:$0xff]  ;;  %1341 = vmatprep.mubr.msk.bf16.mxu1 %vm834_vm4, %v822_v20 }
 0x1af   : > { %801 = vst.msk [vmem:[#allocation2 + $0x78] sm:$0xff] %vm785_vm3, %v1482_v15  ;;  %800 = vst.msk [vmem:[#allocation2 + $0x70] sm:$0xff] %vm785_vm3, %v1481_v16  ;;  %v823_v22 = vpack.c.bf16 %v813_v21, %v812_v19  ;;  %v806_v23 = vld [vmem:[#allocation2 + $0x20] sm:$0xff]  ;;  %v807_v24 = vld [vmem:[#allocation2 + $0x28] sm:$0xff] }
 0x1b0   : > { %v820_v26 = vpack.c.bf16 %v807_v24, %v806_v23 }
 0x1b1   : > { %1342 = vmatmul.mubr.msk.bf16.vlgmr.msra.gmra.mrb[0].mxu1 %vm834_vm4, %v823_v22 }
 0x1b2   : > { %v814_v25 = vld [vmem:[#allocation2 + $0x60] sm:$0xff]  ;;  %v815_v27 = vld [vmem:[#allocation2 + $0x68] sm:$0xff]  ;;  %1337 = vmatprep.mubr.msk.bf16.mxu0 %vm834_vm4, %v820_v26 }
 0x1b3   : > { %v824_v28 = vpack.c.bf16 %v815_v27, %v814_v25  ;;  %v808_v29 = vld [vmem:[#allocation2 + $0x30] sm:$0xff]  ;;  %v809_v30 = vld [vmem:[#allocation2 + $0x38] sm:$0xff] }
 0x1b4   : > { %v821_v32 = vpack.c.bf16 %v809_v30, %v808_v29 }
 0x1b5   : > { %1345 = vmatprep.mubr.msk.bf16.mxu1 %vm834_vm4, %v824_v28 }
 0x1b6   : > { %v816_v31 = vld [vmem:[#allocation2 + $0x70] sm:$0xff]  ;;  %v817_v33 = vld [vmem:[#allocation2 + $0x78] sm:$0xff]  ;;  %1338 = vmatmul.mubr.msk.bf16.gmra.mrb[4].mxu0 %vm834_vm4, %v821_v32 }
 0x1b7   : > { %v825_v34 = vpack.c.bf16 %v817_v33, %v816_v31 }
 0x1b9   : > { %1346 = vmatmul.mubr.msk.bf16.gmra.mrb[4].mxu1 %vm834_vm4, %v825_v34 }
 0x280   : > { %v1335_v36 = vpop.f32.mrb[0].mxu0 }
 0x281   : > { %v906_v37 = vadd.f32 %v1335_v36, %v1762_v35  ;;  %v897_v38 = vpop.f32.mrb[1].mxu0 }
 0x282   : > { %v898_v39 = vadd.f32 %v1762_v35, %v897_v38  ;;  %v1336_v40 = vpop.f32.mrb[2].mxu0 }
 0x283   : > { %v962_v41 = vmax.f32 %v906_v37, 0.0  ;;  %v909_v42 = vadd.f32 %v1336_v40, %v1762_v35  ;;  %v900_v43 = vpop.f32.mrb[3].mxu0 }
 0x284   : > { %v960_v44 = vmax.f32 %v898_v39, 0.0  ;;  %v901_v45 = vadd.f32 %v1762_v35, %v900_v43  ;;  %v1343_v46 = vpop.f32.mrb[0].mxu1 }
 0x285   : > { %v1221_v47 = vpack.c.bf16 %v962_v41, %v962_v41  ;;  %v963_v48 = vmax.f32 %v909_v42, 0.0  ;;  %v938_v49 = vadd.f32 %v1343_v46, %v1762_v35  ;;  %v929_v50 = vpop.f32.mrb[1].mxu1 }
 0x286   : > { %v1219_v51 = vpack.c.bf16 %v960_v44, %v960_v44  ;;  %v961_v52 = vmax.f32 %v901_v45, 0.0  ;;  %v930_v53 = vadd.f32 %v1762_v35, %v929_v50  ;;  %v1344_v54 = vpop.f32.mrb[2].mxu1 }
 0x287   : > { %1043 = vst.msk [vmem:[%s1667_s14 + $0x8] sm:$0xf] %vm1040_vm5, %v1221_v47  ;;  %v1222_v55 = vpack.c.bf16 %v963_v48, %v963_v48  ;;  %v970_v56 = vmax.f32 %v938_v49, 0.0  ;;  %v941_v57 = vadd.f32 %v1344_v54, %v1762_v35  ;;  %v932_v58 = vpop.f32.mrb[3].mxu1 }
 0x288   : > { %1041 = vst.msk [vmem:[%s1667_s14] sm:$0xf] %vm1040_vm5, %v1219_v51  ;;  %v1220_v59 = vpack.c.bf16 %v961_v52, %v961_v52  ;;  %v968_v60 = vmax.f32 %v930_v53, 0.0  ;;  %v933_v61 = vadd.f32 %v1762_v35, %v932_v58 }
 0x289   : > { %1044 = vst.msk [vmem:[%s1667_s14 + $0xc] sm:$0xf] %vm1040_vm5, %v1222_v55  ;;  %v1229_v62 = vpack.c.bf16 %v970_v56, %v970_v56  ;;  %v971_v63 = vmax.f32 %v941_v57, 0.0  ;;  %v1339_v3 = vpop.f32.mrb[4].mxu0 }
 0x28a   : > { %1042 = vst.msk [vmem:[%s1667_s14 + $0x4] sm:$0xf] %vm1040_vm5, %v1220_v59  ;;  %v1227_v0 = vpack.c.bf16 %v968_v60, %v968_v60  ;;  %v969_v1 = vmax.f32 %v933_v61, 0.0  ;;  %v922_v5 = vadd.f32 %v1339_v3, %v1762_v35  ;;  %v913_v6 = vpop.f32.mrb[5].mxu0 }
 0x28b   : > { %1051 = vst.msk [vmem:[%s1667_s14 + $0x28] sm:$0xf] %vm1040_vm5, %v1229_v62  ;;  %v1230_v2 = vpack.c.bf16 %v971_v63, %v971_v63  ;;  %v914_v8 = vadd.f32 %v1762_v35, %v913_v6  ;;  %v1340_v10 = vpop.f32.mrb[6].mxu0 }
 0x28c   : > { %1049 = vst.msk [vmem:[%s1667_s14 + $0x20] sm:$0xf] %vm1040_vm5, %v1227_v0  ;;  %v1228_v4 = vpack.c.bf16 %v969_v1, %v969_v1  ;;  %v1347_v7 = vpop.f32.mrb[4].mxu1  ;;  %v966_v12 = vmax.f32 %v922_v5, 0.0  ;;  %v925_v13 = vadd.f32 %v1340_v10, %v1762_v35  ;;  %v916_v15 = vpop.f32.mrb[7].mxu0 }
 0x28d   : > { %1052 = vst.msk [vmem:[%s1667_s14 + $0x2c] sm:$0xf] %vm1040_vm5, %v1230_v2  ;;  %v954_v9 = vadd.f32 %v1347_v7, %v1762_v35  ;;  %v945_v11 = vpop.f32.mrb[5].mxu1  ;;  %v964_v17 = vmax.f32 %v914_v8, 0.0  ;;  %v917_v19 = vadd.f32 %v1762_v35, %v916_v15 }
 0x28e   : > { %1050 = vst.msk [vmem:[%s1667_s14 + $0x24] sm:$0xf] %vm1040_vm5, %v1228_v4  ;;  %v946_v14 = vadd.f32 %v1762_v35, %v945_v11  ;;  %v1348_v16 = vpop.f32.mrb[6].mxu1  ;;  %v1225_v22 = vpack.c.bf16 %v966_v12, %v966_v12  ;;  %v967_v23 = vmax.f32 %v925_v13, 0.0 }
 0x28f   : > { %v974_v18 = vmax.f32 %v954_v9, 0.0  ;;  %v957_v20 = vadd.f32 %v1348_v16, %v1762_v35  ;;  %v948_v21 = vpop.f32.mrb[7].mxu1  ;;  %v1223_v26 = vpack.c.bf16 %v964_v17, %v964_v17  ;;  %v965_v28 = vmax.f32 %v917_v19, 0.0 }
 0x290   : > { %v972_v24 = vmax.f32 %v946_v14, 0.0  ;;  %v949_v25 = vadd.f32 %v1762_v35, %v948_v21  ;;  %1047 = vst.msk [vmem:[%s1667_s14 + $0x18] sm:$0xf] %vm1040_vm5, %v1225_v22  ;;  %v1226_v30 = vpack.c.bf16 %v967_v23, %v967_v23 }
 0x291   : > { %v1233_v27 = vpack.c.bf16 %v974_v18, %v974_v18  ;;  %v975_v29 = vmax.f32 %v957_v20, 0.0  ;;  %1045 = vst.msk [vmem:[%s1667_s14 + $0x10] sm:$0xf] %vm1040_vm5, %v1223_v26  ;;  %v1224_v33 = vpack.c.bf16 %v965_v28, %v965_v28 }
 0x292   : > { %v1231_v31 = vpack.c.bf16 %v972_v24, %v972_v24  ;;  %v973_v32 = vmax.f32 %v949_v25, 0.0  ;;  %1048 = vst.msk [vmem:[%s1667_s14 + $0x1c] sm:$0xf] %vm1040_vm5, %v1226_v30 }
 0x293   : > { %1055 = vst.msk [vmem:[%s1667_s14 + $0x38] sm:$0xf] %vm1040_vm5, %v1233_v27  ;;  %v1234_v34 = vpack.c.bf16 %v975_v29, %v975_v29  ;;  %1046 = vst.msk [vmem:[%s1667_s14 + $0x14] sm:$0xf] %vm1040_vm5, %v1224_v33 }
 0x294   : > { %1053 = vst.msk [vmem:[%s1667_s14 + $0x30] sm:$0xf] %vm1040_vm5, %v1231_v31  ;;  %v1232_v35 = vpack.c.bf16 %v973_v32, %v973_v32 }
 0x295   : > { %1056 = vst.msk [vmem:[%s1667_s14 + $0x3c] sm:$0xf] %vm1040_vm5, %v1234_v34 }
 0x296   : > { %1054 = vst.msk [vmem:[%s1667_s14 + $0x34] sm:$0xf] %vm1040_vm5, %v1232_v35 }
 0x297 PF: > { %s15_s24 = sadd.s32 1, %s1537_s24   ;;  %s1839_s18 = smov %s1517_s19 }
 0x298   : > { %p12_p0 = scmp.ge.s32.totalorder %s15_s24, 6   ;;  %s1840_s19 = smov %s1622_s6 }
 0x299   : > { %s1841_s20 = smov %s1529_s22  ;;  %s1842_s21 = smov %s1533_s23 }
 0x29a   : > { %s1843_s22 = smov %s1846_s25  ;;  %s1844_s23 = smov %s1850_s26 }
 0x29b   :  { %14 = sbr.rel (!%p12_p0) target bundleno = 4 (0x4), region = 130 }

</bundles_post_ra>
